<compile_context>
chip_gen: v5e
topology: v5e:2x2
jax: 0.10.0
libtpu: 0.0.40
codegen_flags: <defaults>
</compile_context>

<pallas_src>
import functools

import jax
import jax.numpy as jnp
from jax.experimental import pallas as pl
from jax.experimental.pallas import tpu as pltpu


def _round_up(n, m):
    return ((n + m - 1) // m) * m


def lstm_fc_kernel(x_ref, wih_ref, b_ref, wfc_ref, bfc_ref, out_ref):
    """One zero-state LSTM step + final Linear for one batch tile.

    x_ref   : (Bb, 1)      f32 inputs (D == 1)
    wih_ref : (1, 3*Hp)    f32 packed [0.5*W_i | W_g | 0.5*W_o]^T, lane-padded
    b_ref   : (1, 3*Hp)    f32 packed [0.5*b_i | b_g | 0.5*b_o], lane-padded
    wfc_ref : (Hp, Op)     bf16 0.5*W_fc^T (o-gate's outer 0.5 folded in),
                           zero-padded to lane multiples
    bfc_ref : (1, Op)      f32 b_fc, zero-padded
    out_ref : (Bb, Op)     f32 lane-dense output (first O lanes are real)
    """
    Hp = wfc_ref.shape[0]
    x = x_ref[...]                                            # (Bb, 1)

    # Per-gate slabs computed sequentially: ~1/3 the live vregs of a fused
    # (Bb, 3*Hp) gates tensor. sigmoid(z) == 0.5*(1 + tanh(z/2)); the /2 is
    # pre-folded into the packed weights/bias.
    # input gate
    i_g = 0.5 * (1.0 + jnp.tanh(x * wih_ref[:, 0:Hp] + b_ref[:, 0:Hp]))
    # cell candidate
    g_g = jnp.tanh(x * wih_ref[:, Hp:2 * Hp] + b_ref[:, Hp:2 * Hp])
    # c0 == 0  =>  c = i * g (forget gate eliminated);  h0 == 0 => no W_hh.
    tanh_c = jnp.tanh(i_g * g_g)                              # (Bb, Hp)
    # output gate; its sigmoid's outer 0.5 lives inside wfc_ref.
    h = (1.0 + jnp.tanh(x * wih_ref[:, 2 * Hp:3 * Hp]
                        + b_ref[:, 2 * Hp:3 * Hp])) * tanh_c  # (Bb, Hp)

    # Final Linear: bf16 operands on the MXU, f32 accumulation. Padded h lanes
    # are exactly 0 and padded wfc rows/cols are 0, so padded output lanes = 0.
    out_ref[...] = (
        jnp.dot(h.astype(jnp.bfloat16), wfc_ref[...],
                preferred_element_type=jnp.float32)
        + bfc_ref[...]
    )


@functools.partial(jax.jit, static_argnames=("output_dim", "block_b"))
def _lstm_forward_impl(x, w_ih_p, b_p, w_fc_p, b_fc_p, *, output_dim, block_b):
    B, D = x.shape
    assert D == 1, "kernel packs D==1 (module default input_dim=1)"
    Hp, Op = w_fc_p.shape

    # Batch tile: as large as the batch (single grid step) for small B,
    # block_b rows otherwise; always a multiple of 8 (sublane alignment).
    bb = min(block_b, _round_up(B, 8))
    Bp = _round_up(B, bb)
    if Bp != B:
        x = jnp.pad(x, ((0, Bp - B), (0, 0)))   # padded rows are sliced off
    grid = (Bp // bb,)

    out_padded = pl.pallas_call(
        lstm_fc_kernel,
        out_shape=jax.ShapeDtypeStruct((Bp, Op), jnp.float32),
        grid_spec=pltpu.PrefetchScalarGridSpec(
            num_scalar_prefetch=0,
            grid=grid,
            in_specs=[
                pl.BlockSpec((bb, 1), lambda i: (i, 0)),          # x tile
                pl.BlockSpec((1, 3 * Hp), lambda i: (0, 0)),      # packed W_ih
                pl.BlockSpec((1, 3 * Hp), lambda i: (0, 0)),      # packed bias
                pl.BlockSpec((Hp, Op), lambda i: (0, 0)),         # 0.5*W_fc^T (bf16)
                pl.BlockSpec((1, Op), lambda i: (0, 0)),          # b_fc
            ],
            out_specs=pl.BlockSpec((bb, Op), lambda i: (i, 0)),
        ),
        compiler_params=pltpu.CompilerParams(
            dimension_semantics=("parallel",),   # shard batch tiles across TCs
        ),
    )(x, w_ih_p, b_p, w_fc_p, b_fc_p)

    # output_dim / B are static -> plain static slice (no traced-slice error).
    return out_padded[:B, :output_dim]


def lstm_forward(x, params, *, block_b=256):
    """x: (B, 1) f32 -> (B, O) f32."""
    return _lstm_forward_impl(
        x,
        params["w_ih_packed"], params["b_packed"],
        params["w_fc_packed"], params["b_fc_packed"],
        output_dim=params["output_dim"],   # plain Python int -> static
        block_b=block_b,
    )


def init_params(key, input_dim, hidden_dim, output_dim):
    """PyTorch-style uniform(-1/sqrt(H), 1/sqrt(H)) init + kernel packing."""
    assert input_dim == 1
    H, D, O = hidden_dim, input_dim, output_dim
    ks = jax.random.split(key, 6)
    bound = 1.0 / jnp.sqrt(jnp.float32(H))
    u = lambda k, shape: jax.random.uniform(
        k, shape, jnp.float32, minval=-bound, maxval=bound)

    # Raw PyTorch-layout parameters (gate order: i, f, g, o).
    w_ih = u(ks[0], (4 * H, D))
    w_hh = u(ks[1], (4 * H, H))     # unused at runtime (h0 == 0); kept for ref
    b_ih = u(ks[2], (4 * H,))
    b_hh = u(ks[3], (4 * H,))
    w_fc = u(ks[4], (O, H))
    b_fc = u(ks[5], (O,))

    Hp = _round_up(H, 128)
    Op = _round_up(O, 128)

    def pad_cols(a, width):
        return jnp.pad(a, ((0, 0), (0, width - a.shape[1])))

    b_comb = (b_ih + b_hh).reshape(1, -1)            # (1, 4H)
    w_ih_t = w_ih.T                                  # (1, 4H)  (D == 1)

    # Gate blocks (drop f-gate: c0 == 0). Fold the sigmoid's inner /2 into the
    # i/o weights & bias.
    w_i = 0.5 * w_ih_t[:, 0 * H:1 * H]
    w_g =       w_ih_t[:, 2 * H:3 * H]
    w_o = 0.5 * w_ih_t[:, 3 * H:4 * H]
    b_i = 0.5 * b_comb[:, 0 * H:1 * H]
    b_g =       b_comb[:, 2 * H:3 * H]
    b_o = 0.5 * b_comb[:, 3 * H:4 * H]

    w_ih_packed = jnp.concatenate(
        [pad_cols(w_i, Hp), pad_cols(w_g, Hp), pad_cols(w_o, Hp)], axis=1)
    b_packed = jnp.concatenate(
        [pad_cols(b_i, Hp), pad_cols(b_g, Hp), pad_cols(b_o, Hp)], axis=1)

    # fc weights: (Hp, Op), zero-padded, with the o-gate's outer 0.5 folded in
    # (FC is linear so the scale commutes), stored bf16 for the MXU fast path.
    w_fc_packed = (jnp.zeros((Hp, Op), jnp.float32)
                   .at[:H, :O].set(0.5 * w_fc.T)).astype(jnp.bfloat16)
    b_fc_packed = jnp.zeros((1, Op), jnp.float32).at[0, :O].set(b_fc)

    return {
        "w_ih_packed": w_ih_packed,     # (1, 3*Hp) f32
        "b_packed": b_packed,           # (1, 3*Hp) f32
        "w_fc_packed": w_fc_packed,     # (Hp, Op)  bf16
        "b_fc_packed": b_fc_packed,     # (1, Op)   f32
        "output_dim": O,                # python int (static)
        # raw versions for the pure-JAX reference
        "_raw": (w_ih, w_hh, b_ih, b_hh, w_fc, b_fc),
    }


def reference_forward(x, params):
    """Pure-JAX f32 replica of the PyTorch forward (seq_len=1, zero state)."""
    w_ih, w_hh, b_ih, b_hh, w_fc, b_fc = params["_raw"]
    H = w_hh.shape[1]
    B = x.shape[0]
    h_prev = jnp.zeros((B, H), jnp.float32)
    c_prev = jnp.zeros((B, H), jnp.float32)
    gates = x @ w_ih.T + b_ih + h_prev @ w_hh.T + b_hh
    i_g = jax.nn.sigmoid(gates[:, 0 * H:1 * H])
    f_g = jax.nn.sigmoid(gates[:, 1 * H:2 * H])
    g_g = jnp.tanh(gates[:, 2 * H:3 * H])
    o_g = jax.nn.sigmoid(gates[:, 3 * H:4 * H])
    c = f_g * c_prev + i_g * g_g
    h = o_g * jnp.tanh(c)
    return h @ w_fc.T + b_fc


if __name__ == "__main__":
    # Module defaults: input_dim=1, hidden_dim=350 (padded to 384 lanes),
    # output_dim=1 (padded to 128 lanes). Small batch -> single grid step.
    B, D, H, O = 16, 1, 350, 1

    key = jax.random.PRNGKey(0)
    kx, kp = jax.random.split(key)
    x = jax.random.normal(kx, (B, D), jnp.float32)
    params = init_params(kp, D, H, O)

    out = lstm_forward(x, params)
    out = jax.block_until_ready(out)

    ref = reference_forward(x, params)
    assert out.shape == (B, O), out.shape
    # bf16 operands at the MXU boundary (f32 accumulate) -> looser tolerance
    # than the previous all-f32 check.
    assert jnp.allclose(out, ref, atol=2e-2, rtol=2e-2), (out, ref)

    print("KERNEL_OK")
</pallas_src>

<mosaic_0001>
module attributes {stable_mosaic.version = 11 : i64} {
  func.func @lstm_fc_kernel(%arg0: i32, %arg1: memref<16x1xf32, #tpu.memory_space<vmem>>, %arg2: memref<1x1152xf32, #tpu.memory_space<vmem>>, %arg3: memref<1x1152xf32, #tpu.memory_space<vmem>>, %arg4: memref<384x128xbf16, #tpu.memory_space<vmem>>, %arg5: memref<1x128xf32, #tpu.memory_space<vmem>>, %arg6: memref<16x128xf32, #tpu.memory_space<vmem>>) attributes {dimension_semantics = [#tpu.dimension_semantics<parallel>], iteration_bounds = array<i64: 1>, scalar_prefetch = 0 : i64, scratch_operands = 0 : i64, tpu.core_type = #tpu.core_type<tc>, window_params = [{transform_indices = @transform_0, window_bounds = array<i64: 16, 1>}, {pipeline_mode = #tpu.pipeline_mode<synchronous>, transform_indices = @transform_1, window_bounds = array<i64: 1, 1152>}, {pipeline_mode = #tpu.pipeline_mode<synchronous>, transform_indices = @transform_2, window_bounds = array<i64: 1, 1152>}, {pipeline_mode = #tpu.pipeline_mode<synchronous>, transform_indices = @transform_3, window_bounds = array<i64: 384, 128>}, {pipeline_mode = #tpu.pipeline_mode<synchronous>, transform_indices = @transform_4, window_bounds = array<i64: 1, 128>}, {transform_indices = @transform_5, window_bounds = array<i64: 16, 128>}]} {
    %c0 = arith.constant 0 : index
    %c0_0 = arith.constant 0 : index
    %0 = vector.load %arg1[%c0, %c0_0] : memref<16x1xf32, #tpu.memory_space<vmem>>, vector<16x1xf32>
    %c0_1 = arith.constant 0 : index
    %c0_2 = arith.constant 0 : index
    %1 = vector.load %arg2[%c0_1, %c0_2] : memref<1x1152xf32, #tpu.memory_space<vmem>>, vector<1x384xf32>
    %2 = vector.broadcast %0 : vector<16x1xf32> to vector<16x384xf32>
    %3 = vector.broadcast %1 : vector<1x384xf32> to vector<16x384xf32>
    %4 = arith.mulf %2, %3 : vector<16x384xf32>
    %c0_3 = arith.constant 0 : index
    %c0_4 = arith.constant 0 : index
    %5 = vector.load %arg3[%c0_3, %c0_4] : memref<1x1152xf32, #tpu.memory_space<vmem>>, vector<1x384xf32>
    %6 = vector.broadcast %5 : vector<1x384xf32> to vector<16x384xf32>
    %7 = arith.addf %4, %6 : vector<16x384xf32>
    %8 = math.tanh %7 : vector<16x384xf32>
    %cst = arith.constant 1.000000e+00 : f32
    %9 = vector.broadcast %cst : f32 to vector<16x384xf32>
    %10 = arith.addf %9, %8 : vector<16x384xf32>
    %cst_5 = arith.constant 5.000000e-01 : f32
    %11 = vector.broadcast %cst_5 : f32 to vector<16x384xf32>
    %12 = arith.mulf %11, %10 : vector<16x384xf32>
    %c0_6 = arith.constant 0 : index
    %c384 = arith.constant 384 : index
    %13 = vector.load %arg2[%c0_6, %c384] : memref<1x1152xf32, #tpu.memory_space<vmem>>, vector<1x384xf32>
    %14 = vector.broadcast %0 : vector<16x1xf32> to vector<16x384xf32>
    %15 = vector.broadcast %13 : vector<1x384xf32> to vector<16x384xf32>
    %16 = arith.mulf %14, %15 : vector<16x384xf32>
    %c0_7 = arith.constant 0 : index
    %c384_8 = arith.constant 384 : index
    %17 = vector.load %arg3[%c0_7, %c384_8] : memref<1x1152xf32, #tpu.memory_space<vmem>>, vector<1x384xf32>
    %18 = vector.broadcast %17 : vector<1x384xf32> to vector<16x384xf32>
    %19 = arith.addf %16, %18 : vector<16x384xf32>
    %20 = math.tanh %19 : vector<16x384xf32>
    %21 = arith.mulf %12, %20 : vector<16x384xf32>
    %22 = math.tanh %21 : vector<16x384xf32>
    %c0_9 = arith.constant 0 : index
    %c768 = arith.constant 768 : index
    %23 = vector.load %arg2[%c0_9, %c768] : memref<1x1152xf32, #tpu.memory_space<vmem>>, vector<1x384xf32>
    %24 = vector.broadcast %0 : vector<16x1xf32> to vector<16x384xf32>
    %25 = vector.broadcast %23 : vector<1x384xf32> to vector<16x384xf32>
    %26 = arith.mulf %24, %25 : vector<16x384xf32>
    %c0_10 = arith.constant 0 : index
    %c768_11 = arith.constant 768 : index
    %27 = vector.load %arg3[%c0_10, %c768_11] : memref<1x1152xf32, #tpu.memory_space<vmem>>, vector<1x384xf32>
    %28 = vector.broadcast %27 : vector<1x384xf32> to vector<16x384xf32>
    %29 = arith.addf %26, %28 : vector<16x384xf32>
    %30 = math.tanh %29 : vector<16x384xf32>
    %cst_12 = arith.constant 1.000000e+00 : f32
    %31 = vector.broadcast %cst_12 : f32 to vector<16x384xf32>
    %32 = arith.addf %31, %30 : vector<16x384xf32>
    %33 = arith.mulf %32, %22 : vector<16x384xf32>
    %34 = arith.truncf %33 : vector<16x384xf32> to vector<16x384xbf16>
    %c0_13 = arith.constant 0 : index
    %c0_14 = arith.constant 0 : index
    %35 = vector.load %arg4[%c0_13, %c0_14] : memref<384x128xbf16, #tpu.memory_space<vmem>>, vector<384x128xbf16>
    %cst_15 = arith.constant dense<0.000000e+00> : vector<16x128xf32>
    %36 = tpu.matmul %34, %35, %cst_15 {dimension_numbers = #tpu.dot_dimension_numbers<[1], [0], [0], [1], [0, 0, 1, 1], [], []>} : vector<16x384xbf16>, vector<384x128xbf16>, vector<16x128xf32> -> vector<16x128xf32>
    %c0_16 = arith.constant 0 : index
    %c0_17 = arith.constant 0 : index
    %37 = vector.load %arg5[%c0_16, %c0_17] : memref<1x128xf32, #tpu.memory_space<vmem>>, vector<1x128xf32>
    %38 = vector.broadcast %37 : vector<1x128xf32> to vector<16x128xf32>
    %39 = arith.addf %36, %38 : vector<16x128xf32>
    %c0_18 = arith.constant 0 : index
    %c0_19 = arith.constant 0 : index
    %40 = vector.load %arg6[%c0_18, %c0_19] : memref<16x128xf32, #tpu.memory_space<vmem>>, vector<16x128xf32>
    tpu.vector_store %arg6[%c0_18, %c0_19], %39 {strides = array<i32>} : memref<16x128xf32, #tpu.memory_space<vmem>>, vector<16x128xf32>,
    return
  }
  func.func @transform_0(%arg0: i32) -> (i32, i32) {
    %c0_i32 = arith.constant 0 : i32
    %c0_i32_0 = arith.constant 0 : i32
    return %arg0, %c0_i32 : i32, i32
  }
  func.func @transform_1(%arg0: i32) -> (i32, i32) {
    %c0_i32 = arith.constant 0 : i32
    %c0_i32_0 = arith.constant 0 : i32
    %c0_i32_1 = arith.constant 0 : i32
    return %c0_i32, %c0_i32_0 : i32, i32
  }
  func.func @transform_2(%arg0: i32) -> (i32, i32) {
    %c0_i32 = arith.constant 0 : i32
    %c0_i32_0 = arith.constant 0 : i32
    %c0_i32_1 = arith.constant 0 : i32
    return %c0_i32, %c0_i32_0 : i32, i32
  }
  func.func @transform_3(%arg0: i32) -> (i32, i32) {
    %c0_i32 = arith.constant 0 : i32
    %c0_i32_0 = arith.constant 0 : i32
    %c0_i32_1 = arith.constant 0 : i32
    return %c0_i32, %c0_i32_0 : i32, i32
  }
  func.func @transform_4(%arg0: i32) -> (i32, i32) {
    %c0_i32 = arith.constant 0 : i32
    %c0_i32_0 = arith.constant 0 : i32
    %c0_i32_1 = arith.constant 0 : i32
    return %c0_i32, %c0_i32_0 : i32, i32
  }
  func.func @transform_5(%arg0: i32) -> (i32, i32) {
    %c0_i32 = arith.constant 0 : i32
    %c0_i32_0 = arith.constant 0 : i32
    return %arg0, %c0_i32 : i32, i32
  }
}

</mosaic_0001>

<bundles_post_ra>
// kernel: _lstm_forward_impl.1
= control target key start
LH: loop header
LB: loop body
LE: loop exit
PB: predicated region body
PF: predicated region fallthrough
CT: control target
= control target key end

     0   :  { %10 = vsyncpa [#allocation3], 0  ;;  %s634_s21 = smov [#allocation2]   ;;  %s635_s23 = smov 64   ;;  %s756_s0 = inlined_call_operand.vmem [shape: f32[16,1], index: 0, kind: input, shape index: {}]   ;;  %s757_s1 = inlined_call_operand.vmem [shape: f32[1,1152], index: 1, kind: input, shape index: {}]   ;;  %s758_s2 = inlined_call_operand.vmem [shape: f32[1,1152], index: 2, kind: input, shape index: {}]   ;;  %s759_s3 = inlined_call_operand.hbm [shape: bf16[384,128], index: 3, kind: input, shape index: {}]   ;;  %s760_s4 = inlined_call_operand.vmem [shape: f32[1,128], index: 4, kind: input, shape index: {}]   ;;  %s761_s5 = inlined_call_operand.vmem [shape: f32[16,128], index: 5, kind: output, shape index: {}]  }
   0x1   :  { %s21_s20 = sshll.u32 %s759_s3, 4  ;;  %s23_s22 = sshll.u32 %s634_s21, 4  ;;  %s22_s20 = int_to_ptr.hbm [resolvable:$true] %s21_s20  ;;  %s24_s22 = int_to_ptr.vmem [resolvable:$true] %s23_s22 }
   0x2   :  { %s636_s24 = smov 4  }
   0x3   :  { %29 = dma.hbm_to_vmem [thread:$0]  %s22_s20, 3072, %s24_s22, [#allocation3], %s635_s23, %s635_s23, %s636_s24  }
   0x4   :  { %632 = dma.done.wait [#allocation3], 3072  }
   0x5   :  { %633 = vsyncadd [#allocation3], 4294964224  ;;  %v637_v0 = vmov 0   ;;  %v36_v1 = vld [vmem:[%s756_s0] sm:$0xff]  ;;  %v37_v2 = vld [vmem:[%s756_s0 + $0x8] sm:$0xff] }
   0x6   :  { %558 = vset.pattern.permute.xlu0 %v637_v0  ;;  %v537_v3 = vld [vmem:[#allocation2 + $0x38] sm:$0xff]  ;;  %v536_v6 = vld [vmem:[#allocation2 + $0x30] sm:$0xff]  ;;  %v535_v9 = vld [vmem:[#allocation2 + $0x28] sm:$0xff] }
   0x7   :  { %41 = vperm.xlu0 %558, %v36_v1   ;;  %v545_v4 = vld [vmem:[#allocation2 + $0x78] sm:$0xff]  ;;  %385 = vmatpush.bf16.msra.mxu0 %v537_v3  ;;  %v544_v7 = vld [vmem:[#allocation2 + $0x70] sm:$0xff]  ;;  %v543_v10 = vld [vmem:[#allocation2 + $0x68] sm:$0xff] }
   0x8   :  { %v553_v5 = vld [vmem:[#allocation2 + $0xb8] sm:$0xff]  ;;  %399 = vmatpush.bf16.msra.mxu1 %v545_v4  ;;  %v552_v8 = vld [vmem:[#allocation2 + $0xb0] sm:$0xff]  ;;  %v551_v11 = vld [vmem:[#allocation2 + $0xa8] sm:$0xff] }
   0x9   :  { %413 = vmatpush.bf16.msra.mxu2 %v553_v5  ;;  %v534_v12 = vld [vmem:[#allocation2 + $0x20] sm:$0xff]  ;;  %v533_v15 = vld [vmem:[#allocation2 + $0x18] sm:$0xff]  ;;  %v532_v18 = vld [vmem:[#allocation2 + $0x10] sm:$0xff] }
   0xa   :  { %v542_v13 = vld [vmem:[#allocation2 + $0x60] sm:$0xff]  ;;  %v541_v16 = vld [vmem:[#allocation2 + $0x58] sm:$0xff]  ;;  %v540_v19 = vld [vmem:[#allocation2 + $0x50] sm:$0xff] }
   0xb   :  { %386 = vmatpush.bf16.msra.mxu0 %v536_v6  ;;  %v550_v14 = vld [vmem:[#allocation2 + $0xa0] sm:$0xff]  ;;  %v549_v17 = vld [vmem:[#allocation2 + $0x98] sm:$0xff]  ;;  %v548_v20 = vld [vmem:[#allocation2 + $0x90] sm:$0xff] }
   0xc   :  { %400 = vmatpush.bf16.msra.mxu1 %v544_v7  ;;  %v531_v21 = vld [vmem:[#allocation2 + $0x8] sm:$0xff]  ;;  %v680_v23 = vld [vmem:[%s757_s1] sm:$0x7]  ;;  %v685_v24 = vld [vmem:[%s757_s1 + $0x3] sm:$0x7] }
   0xd   :  { %414 = vmatpush.bf16.msra.mxu2 %v552_v8  ;;  %v539_v22 = vld [vmem:[#allocation2 + $0x48] sm:$0xff]  ;;  %v690_v26 = vld [vmem:[%s758_s2] sm:$0x7]  ;;  %v50_v27 = vperm.slane %v680_v23, 0  ;;  %v51_v29 = vperm.slane %v680_v23, 1  ;;  %v96_v30 = vperm.slane %v685_v24, 0 }
   0xe   :  { %v547_v25 = vld [vmem:[#allocation2 + $0x88] sm:$0xff]  ;;  %v530_v31 = vld [vmem:[#allocation2] sm:$0xff]  ;;  %v64_v34 = vperm.slane %v690_v26, 0  ;;  %v65_v38 = vperm.slane %v690_v26, 1  ;;  %v97_v42 = vperm.slane %v685_v24, 1  ;;  %v52_v57 = vperm.slane %v680_v23, 2 }
   0xf   :  { %46 = vperm.xlu0 %558, %v37_v2   ;;  %387 = vmatpush.bf16.msra.mxu0 %v535_v9  ;;  %v696_v28 = vld [vmem:[%s757_s1 + $0x6] sm:$0x7]  ;;  %v704_v35 = vld [vmem:[%s758_s2 + $0x3] sm:$0x7]  ;;  %v98_v58 = vperm.slane %v685_v24, 2  ;;  %v66_v4 = vperm.slane %v690_v26, 2 }
  0x10   :  { %401 = vmatpush.bf16.msra.mxu1 %v543_v10  ;;  %v538_v32 = vld [vmem:[#allocation2 + $0x40] sm:$0xff]  ;;  %v142_v37 = vperm.slane %v696_v28, 0  ;;  %v110_v44 = vperm.slane %v704_v35, 0  ;;  %v143_v46 = vperm.slane %v696_v28, 1  ;;  %v111_v52 = vperm.slane %v704_v35, 1 }
  0x11   :  { %415 = vmatpush.bf16.msra.mxu2 %v551_v11  ;;  %v546_v33 = vld [vmem:[#allocation2 + $0x80] sm:$0xff]  ;;  %v144_v24 = vperm.slane %v696_v28, 2 }
  0x12   :  { %v714_v40 = vld [vmem:[%s758_s2 + $0x6] sm:$0x7] }
  0x13   :  { %388 = vmatpush.bf16.msra.mxu0 %v534_v12  ;;  %v156_v48 = vperm.slane %v714_v40, 0  ;;  %v157_v54 = vperm.slane %v714_v40, 1 }
  0x14   :  { %402 = vmatpush.bf16.msra.mxu1 %v542_v13 }
  0x15   :  { %416 = vmatpush.bf16.msra.mxu2 %v550_v14 }
  0x17   :  { %389 = vmatpush.bf16.msra.mxu0 %v533_v15 }
  0x18   :  { %403 = vmatpush.bf16.msra.mxu1 %v541_v16 }
  0x19   :  { %417 = vmatpush.bf16.msra.mxu2 %v549_v17 }
  0x1b   :  { %390 = vmatpush.bf16.msra.mxu0 %v532_v18 }
  0x1c   :  { %404 = vmatpush.bf16.msra.mxu1 %v540_v19  ;;  %v112_v19 = vperm.slane %v704_v35, 2 }
  0x1d   :  { %418 = vmatpush.bf16.msra.mxu2 %v548_v20 }
  0x1f   :  { %391 = vmatpush.bf16.msra.mxu0 %v531_v21 }
  0x20   :  { %405 = vmatpush.bf16.msra.mxu1 %v539_v22 }
  0x21   :  { %419 = vmatpush.bf16.msra.mxu2 %v547_v25 }
  0x23   :  { %392 = vmatpush.bf16.msra.mxu0 %v530_v31 }
  0x24   :  { %406 = vmatpush.bf16.msra.mxu1 %v538_v32 }
  0x25   :  { %420 = vmatpush.bf16.msra.mxu2 %v546_v33 }
  0x79   :  { %v706_v36 = vpop.permute.xlu0 %41 }
  0x7a   :  { %v56_v39 = vmul.f32 %v50_v27, %v706_v36  ;;  %v57_v41 = vmul.f32 %v51_v29, %v706_v36  ;;  %v102_v43 = vmul.f32 %v96_v30, %v706_v36  ;;  %v148_v47 = vmul.f32 %v142_v37, %v706_v36 }
  0x7b   :  { %v103_v51 = vmul.f32 %v97_v42, %v706_v36  ;;  %v149_v53 = vmul.f32 %v143_v46, %v706_v36  ;;  %v58_v7 = vmul.f32 %v52_v57, %v706_v36  ;;  %v104_v18 = vmul.f32 %v98_v58, %v706_v36 }
  0x7c   :  { %v70_v45 = vadd.f32 %v64_v34, %v56_v39  ;;  %v71_v49 = vadd.f32 %v65_v38, %v57_v41  ;;  %v116_v50 = vadd.f32 %v110_v44, %v102_v43  ;;  %v162_v56 = vadd.f32 %v156_v48, %v148_v47 }
  0x7d   :  { %v117_v63 = vadd.f32 %v111_v52, %v103_v51  ;;  %v163_v3 = vadd.f32 %v157_v54, %v149_v53  ;;  %v72_v17 = vadd.f32 %v66_v4, %v58_v7  ;;  %v118_v31 = vadd.f32 %v112_v19, %v104_v18 }
  0x7e   :  { %560 = vtanh.f32 %v70_v45 }
  0x7f   :  { %562 = vtanh.f32 %v71_v49 }
  0x80   :  { %564 = vtanh.f32 %v116_v50 }
  0x81   :  { %v727_v55 = vpop.permute.xlu0 %46  ;;  %566 = vtanh.f32 %v162_v56 }
  0x82   :  { %v105_v59 = vmul.f32 %v96_v30, %v727_v55  ;;  %v59_v60 = vmul.f32 %v50_v27, %v727_v55  ;;  %v151_v61 = vmul.f32 %v142_v37, %v727_v55  ;;  %v60_v62 = vmul.f32 %v51_v29, %v727_v55 }
  0x83   :  { %v106_v1 = vmul.f32 %v97_v42, %v727_v55  ;;  %v61_v12 = vmul.f32 %v52_v57, %v727_v55  ;;  %v152_v15 = vmul.f32 %v143_v46, %v727_v55  ;;  %v107_v20 = vmul.f32 %v98_v58, %v727_v55 }
  0x84   :  { %v561_v0 = vpop.eup %560  ;;  %v73_v2 = vadd.f32 %v64_v34, %v59_v60  ;;  %v74_v6 = vadd.f32 %v65_v38, %v60_v62  ;;  %v119_v8 = vadd.f32 %v110_v44, %v105_v59  ;;  %v165_v11 = vadd.f32 %v156_v48, %v151_v61 }
  0x85   :  { %v82_v5 = vadd.f32 1.0, %v561_v0  ;;  %v563_v9 = vpop.eup %562  ;;  %v120_v14 = vadd.f32 %v111_v52, %v106_v1  ;;  %v75_v23 = vadd.f32 %v66_v4, %v61_v12  ;;  %v166_v27 = vadd.f32 %v157_v54, %v152_v15 }
  0x86   :  { %568 = vtanh.f32 %v73_v2  ;;  %v83_v13 = vadd.f32 1.0, %v563_v9  ;;  %v565_v16 = vpop.eup %564  ;;  %v121_v33 = vadd.f32 %v112_v19, %v107_v20  ;;  %v150_v37 = vmul.f32 %v144_v24, %v706_v36  ;;  %v559_v19 = vld [vmem:[%s760_s4] ss:$0 sm:$0xff] }
  0x87   :  { %v88_v10 = vmul.f32 0.5, %v82_v5  ;;  %570 = vtanh.f32 %v117_v63  ;;  %v567_v22 = vpop.eup %566  ;;  %v158_v38 = vperm.slane %v714_v40, 2  ;;  %v153_v42 = vmul.f32 %v144_v24, %v727_v55 }
  0x88   :  { %572 = vtanh.f32 %v163_v3  ;;  %v89_v26 = vmul.f32 0.5, %v83_v13  ;;  %v174_v56 = vadd.f32 1.0, %v567_v22 }
  0x89   :  { %574 = vtanh.f32 %v74_v6  ;;  %v128_v21 = vmul.f32 %v565_v16, %v88_v10  ;;  %v164_v48 = vadd.f32 %v158_v38, %v150_v37  ;;  %v167_v40 = vadd.f32 %v158_v38, %v153_v42 }
  0x8a   :  { %576 = vtanh.f32 %v119_v8 }
  0x8b   :  { %578 = vtanh.f32 %v165_v11 }
  0x8c   :  { %v569_v25 = vpop.eup %568  ;;  %580 = vtanh.f32 %v120_v14 }
  0x8d   :  { %v571_v29 = vpop.eup %570  ;;  %v85_v30 = vadd.f32 1.0, %v569_v25  ;;  %582 = vtanh.f32 %v72_v17 }
  0x8e   :  { %v573_v32 = vpop.eup %572  ;;  %584 = vtanh.f32 %v128_v21  ;;  %v129_v41 = vmul.f32 %v571_v29, %v89_v26 }
  0x8f   :  { %v575_v34 = vpop.eup %574  ;;  %v91_v35 = vmul.f32 0.5, %v85_v30  ;;  %586 = vtanh.f32 %v75_v23  ;;  %v175_v2 = vadd.f32 1.0, %v573_v32 }
  0x90   :  { %v577_v39 = vpop.eup %576  ;;  %v86_v28 = vadd.f32 1.0, %v575_v34  ;;  %588 = vtanh.f32 %v166_v27 }
  0x91   :  { %v579_v43 = vpop.eup %578  ;;  %v131_v44 = vmul.f32 %v577_v39, %v91_v35  ;;  %590 = vtanh.f32 %v118_v31 }
  0x92   :  { %v581_v45 = vpop.eup %580  ;;  %v92_v46 = vmul.f32 0.5, %v86_v28  ;;  %592 = vtanh.f32 %v121_v33  ;;  %v177_v58 = vadd.f32 1.0, %v579_v43 }
  0x93   :  { %v583_v47 = vpop.eup %582  ;;  %594 = vtanh.f32 %v131_v44 }
  0x94   :  { %v585_v49 = vpop.eup %584  ;;  %v132_v50 = vmul.f32 %v581_v45, %v92_v46  ;;  %596 = vtanh.f32 %v129_v41  ;;  %v84_v36 = vadd.f32 1.0, %v583_v47 }
  0x95   :  { %v587_v51 = vpop.eup %586  ;;  %v180_v63 = vmul.f32 %v585_v49, %v174_v56 }
  0x96   :  { %v589_v52 = vpop.eup %588  ;;  %598 = vtanh.f32 %v132_v50  ;;  %v87_v53 = vadd.f32 1.0, %v587_v51  ;;  %v90_v54 = vmul.f32 0.5, %v84_v36 }
  0x97   :  { %v591_v55 = vpop.eup %590  ;;  %600 = vtanh.f32 %v164_v48  ;;  %v178_v3 = vadd.f32 1.0, %v589_v52 }
  0x98   :  { %v593_v57 = vpop.eup %592  ;;  %v93_v59 = vmul.f32 0.5, %v87_v53  ;;  %v130_v60 = vmul.f32 %v591_v55, %v90_v54  ;;  %602 = vtanh.f32 %v167_v40 }
  0x99   :  { %v595_v61 = vpop.eup %594 }
  0x9a   :  { %v597_v62 = vpop.eup %596  ;;  %v183_v0 = vmul.f32 %v595_v61, %v177_v58  ;;  %v133_v1 = vmul.f32 %v593_v57, %v93_v59  ;;  %604 = vtanh.f32 %v130_v60 }
  0x9b   :  { %v181_v7 = vmul.f32 %v597_v62, %v175_v2 }
  0x9c   :  { %v599_v4 = vpop.eup %598  ;;  %v186_v5 = vpack.c.bf16 %v183_v0, %v180_v63  ;;  %606 = vtanh.f32 %v133_v1 }
  0x9d   :  { %v601_v6 = vpop.eup %600  ;;  %v184_v8 = vmul.f32 %v599_v4, %v178_v3 }
  0x9e   :  { %v603_v9 = vpop.eup %602  ;;  %393 = vmatmul.bf16.vlgmr.msra.gmra.mxu0 %v186_v5  ;;  %v176_v12 = vadd.f32 1.0, %v601_v6 }
  0x9f   :  { %v187_v10 = vpack.c.bf16 %v184_v8, %v181_v7  ;;  %v179_v13 = vadd.f32 1.0, %v603_v9 }
  0xa0   :  { %v605_v11 = vpop.eup %604 }
  0xa1   :  { %407 = vmatmul.bf16.vlgmr.msra.gmra.mxu1 %v187_v10  ;;  %v182_v15 = vmul.f32 %v605_v11, %v176_v12 }
  0xa2   :  { %v607_v14 = vpop.eup %606 }
  0xa3   :  { %v185_v16 = vmul.f32 %v607_v14, %v179_v13 }
  0xa5   :  { %v188_v17 = vpack.c.bf16 %v185_v16, %v182_v15 }
  0xa7   :  { %421 = vmatmul.bf16.vlgmr.msra.gmra.mxu2 %v188_v17 }
 0x11b   :  { %v394_v18 = vpop.f32.mrf.mxu0 }
 0x11c   :  { %v395_v20 = vadd.f32 %v559_v19, %v394_v18 }
 0x11e   :  { %v408_v21 = vpop.f32.mrf.mxu1 }
 0x11f   :  { %v409_v22 = vadd.f32 %v408_v21, %v395_v20 }
 0x123   :  { %v396_v24 = vpop.f32.mrf.mxu0 }
 0x124   :  { %v397_v26 = vadd.f32 %v559_v19, %v396_v24 }
 0x126   :  { %v410_v27 = vpop.f32.mrf.mxu1 }
 0x127   :  { %v411_v29 = vadd.f32 %v410_v27, %v397_v26 }
 0x12a   :  { %v422_v23 = vpop.f32.mrf.mxu2 }
 0x12b   :  { %v423_v25 = vadd.f32 %v422_v23, %v409_v22 }
 0x12d   :  { %427 = vst [vmem:[%s761_s5] sm:$0xff] %v423_v25 }
 0x132   :  { %v424_v30 = vpop.f32.mrf.mxu2 }
 0x133   :  { %v425_v31 = vadd.f32 %v424_v30, %v411_v29 }
 0x135   :  { %428 = vst [vmem:[%s761_s5 + $0x8] sm:$0xff] %v425_v31 }
 0x136   :  { %433 = vsyncpa [#allocation3], 1 }

</bundles_post_ra>
